<compile_context>
chip_gen: v7x
topology: tpu7x:2x2x1
jax: 0.10.0
libtpu: 0.0.40
codegen_flags: <defaults>
</compile_context>

<pallas_src>
import functools

import jax
import jax.numpy as jnp
from jax.experimental import pallas as pl
from jax.experimental.pallas import tpu as pltpu  # noqa: F401

EMBED_DIM = 32
NUM_HEADS = 4
SEQ = 8
BATCH = 2


# ------------------------------ Pallas kernel ---------------------------------
def mha_kernel(q_ref, k_ref, v_ref, w_ref, b_ref, o_ref, *, nhead, tsz, bsz):
    # q_ref/k_ref/v_ref: (T*B, E) activations (row = t*B + b).
    # w_ref: (E, 4E) = [Wq.T | Wk.T | Wv.T | Wo.T], b_ref: (1, 4E).
    E = q_ref.shape[-1]
    D = E // nhead
    rows = tsz * bsz
    scaling = float(D) ** -0.5

    w = w_ref[...].astype(jnp.float32)          # (E, 4E) lane-dense slab
    b = b_ref[...].astype(jnp.float32)          # (1, 4E)

    # ---- fused QKV projection: one MXU matmul --------------------------------
    x = jnp.concatenate(
        [q_ref[...], k_ref[...], v_ref[...]], axis=0).astype(jnp.float32)  # (3*rows, E)
    proj = jnp.dot(x, w[:, :3 * E], preferred_element_type=jnp.float32)    # (3*rows, 3E)

    # Diagonal blocks + bias; scaling after bias, exactly like the reference.
    q = (proj[0 * rows:1 * rows, 0 * E:1 * E] + b[:, 0 * E:1 * E]) * scaling
    k = proj[1 * rows:2 * rows, 1 * E:2 * E] + b[:, 1 * E:2 * E]
    v = proj[2 * rows:3 * rows, 2 * E:3 * E] + b[:, 2 * E:3 * E]

    # ---- attention with zero relayouts ---------------------------------------
    # Heads stay as lane blocks; rows keep their (t, b) interleaving. Scores are
    # computed over all T*B rows per head, and pairs from different batch
    # elements are masked out before the softmax (equivalent to per-batch bmm).
    qh = jnp.stack([q[:, h * D:(h + 1) * D] for h in range(nhead)], axis=0)  # (H, rows, D)
    kh = jnp.stack([k[:, h * D:(h + 1) * D] for h in range(nhead)], axis=0)
    vh = jnp.stack([v[:, h * D:(h + 1) * D] for h in range(nhead)], axis=0)

    s = jnp.einsum("hqd,hkd->hqk", qh, kh,
                   preferred_element_type=jnp.float32)                      # (H, rows, rows)

    ri = jax.lax.broadcasted_iota(jnp.int32, (rows, rows), 0)
    ci = jax.lax.broadcasted_iota(jnp.int32, (rows, rows), 1)
    same_batch = (ri % bsz) == (ci % bsz)
    s = jnp.where(same_batch, s, -1e30)

    s = s - jnp.max(s, axis=-1, keepdims=True)
    p = jnp.exp(s)                               # masked entries underflow to exactly 0
    p = p * pl.reciprocal(jnp.sum(p, axis=-1, keepdims=True), approx=False)

    attn = jnp.einsum("hqk,hkd->hqd", p, vh,
                      preferred_element_type=jnp.float32)                   # (H, rows, D)

    # Heads back into the lane axis -> (rows, E), already in (t, b) row order.
    attn2 = jnp.concatenate([attn[h] for h in range(nhead)], axis=-1)       # (rows, E)

    # ---- output projection ----------------------------------------------------
    out = jnp.dot(attn2, w[:, 3 * E:], preferred_element_type=jnp.float32) + b[:, 3 * E:]
    o_ref[...] = out.astype(o_ref.dtype)


# -------------------------- one-time weight packing ----------------------------
def prep_mha_weights(in_proj_weight, in_proj_bias, out_proj_weight, out_proj_bias):
    """Run ONCE at module init: pack all weights/biases into two lane-dense slabs."""
    E = out_proj_weight.shape[0]
    w_all = jnp.concatenate(
        [in_proj_weight[0 * E:1 * E, :].T,
         in_proj_weight[1 * E:2 * E, :].T,
         in_proj_weight[2 * E:3 * E, :].T,
         out_proj_weight.T], axis=1)                       # (E, 4E) = (32, 128)
    b_all = jnp.concatenate([in_proj_bias, out_proj_bias]).reshape(1, 4 * E)  # (1, 128)
    return w_all, b_all


# --------------------------------- wrapper -------------------------------------
@functools.partial(jax.jit, static_argnames=("nhead",))
def multihead_attention_pallas(q, k, v, w_all, b_all, *, nhead,
                               attn_mask=None, key_padding_mask=None):
    """q, k, v: (T, B, E) as in PyTorch. Returns (output (T, B, E), None)."""
    if attn_mask is not None or key_padding_mask is not None:
        raise NotImplementedError(
            "attn_mask / key_padding_mask are not supported by this kernel")
    T, B, E = q.shape
    assert E % nhead == 0, "embed_dim must be divisible by num_heads"

    kernel = functools.partial(mha_kernel, nhead=nhead, tsz=T, bsz=B)
    out2d = pl.pallas_call(
        kernel,
        out_shape=jax.ShapeDtypeStruct((T * B, E), q.dtype),
        # no grid: single invocation, every operand is a full-array VMEM block
    )(q.reshape(T * B, E), k.reshape(T * B, E), v.reshape(T * B, E), w_all, b_all)

    return out2d.reshape(T, B, E), None


# ---------------------------- pure-JAX reference --------------------------------
def mha_ref(q, k, v, in_w, in_b, out_w, out_b, nhead):
    T, B, E = q.shape
    D = E // nhead
    scaling = float(D) ** -0.5
    hp = jax.lax.Precision.HIGHEST
    qp = (jnp.einsum("tbe,fe->tbf", q, in_w[:E], precision=hp) + in_b[:E]) * scaling
    kp = jnp.einsum("tbe,fe->tbf", k, in_w[E:2 * E], precision=hp) + in_b[E:2 * E]
    vp = jnp.einsum("tbe,fe->tbf", v, in_w[2 * E:], precision=hp) + in_b[2 * E:]
    qp = jnp.swapaxes(qp.reshape(T, B * nhead, D), 0, 1)
    kp = jnp.swapaxes(kp.reshape(T, B * nhead, D), 0, 1)
    vp = jnp.swapaxes(vp.reshape(T, B * nhead, D), 0, 1)
    s = jnp.einsum("btd,bsd->bts", qp, kp, precision=hp)
    p = jax.nn.softmax(s, axis=-1)
    o = jnp.einsum("bts,bsd->btd", p, vp, precision=hp)
    o = jnp.swapaxes(o, 0, 1).reshape(T, B, E)
    return jnp.einsum("tbe,fe->tbf", o, out_w, precision=hp) + out_b


# ------------------------------------ main --------------------------------------
if __name__ == "__main__":
    key = jax.random.PRNGKey(0)
    kq, kk, kv, kw, kb, kow, kob = jax.random.split(key, 7)
    T, B, E, H = SEQ, BATCH, EMBED_DIM, NUM_HEADS

    q = jax.random.normal(kq, (T, B, E), jnp.float32)
    k = jax.random.normal(kk, (T, B, E), jnp.float32)
    v = jax.random.normal(kv, (T, B, E), jnp.float32)

    in_proj_weight = 0.1 * jax.random.normal(kw, (3 * E, E), jnp.float32)
    in_proj_bias = 0.1 * jax.random.normal(kb, (3 * E,), jnp.float32)
    out_proj_weight = 0.1 * jax.random.normal(kow, (E, E), jnp.float32)
    out_proj_bias = 0.1 * jax.random.normal(kob, (E,), jnp.float32)

    # One-time weight packing (module init time, NOT per forward call).
    w_all, b_all = prep_mha_weights(in_proj_weight, in_proj_bias,
                                    out_proj_weight, out_proj_bias)
    w_all, b_all = jax.block_until_ready((w_all, b_all))

    out, _ = multihead_attention_pallas(q, k, v, w_all, b_all, nhead=H)
    out = jax.block_until_ready(out)

    ref = mha_ref(q, k, v, in_proj_weight, in_proj_bias,
                  out_proj_weight, out_proj_bias, H)
    assert out.shape == (T, B, E)
    err = float(jnp.max(jnp.abs(out - ref)))
    assert jnp.allclose(out, ref, atol=1e-4, rtol=1e-4), f"mismatch vs ref: {err}"

    print("KERNEL_OK")
</pallas_src>

<mosaic_0001>
module attributes {stable_mosaic.version = 11 : i64} {
  func.func @mha_kernel(%arg0: memref<16x32xf32, #tpu.memory_space<vmem>>, %arg1: memref<16x32xf32, #tpu.memory_space<vmem>>, %arg2: memref<16x32xf32, #tpu.memory_space<vmem>>, %arg3: memref<32x128xf32, #tpu.memory_space<vmem>>, %arg4: memref<1x128xf32, #tpu.memory_space<vmem>>, %arg5: memref<16x32xf32, #tpu.memory_space<vmem>>) attributes {dimension_semantics = [], scalar_prefetch = 0 : i64, scratch_operands = 0 : i64, tpu.core_type = #tpu.core_type<tc>} {
    %c0 = arith.constant 0 : index
    %c0_0 = arith.constant 0 : index
    %0 = vector.load %arg3[%c0, %c0_0] : memref<32x128xf32, #tpu.memory_space<vmem>>, vector<32x128xf32>
    %c0_1 = arith.constant 0 : index
    %c0_2 = arith.constant 0 : index
    %1 = vector.load %arg4[%c0_1, %c0_2] : memref<1x128xf32, #tpu.memory_space<vmem>>, vector<1x128xf32>
    %c0_3 = arith.constant 0 : index
    %c0_4 = arith.constant 0 : index
    %2 = vector.load %arg0[%c0_3, %c0_4] : memref<16x32xf32, #tpu.memory_space<vmem>>, vector<16x32xf32>
    %c0_5 = arith.constant 0 : index
    %c0_6 = arith.constant 0 : index
    %3 = vector.load %arg1[%c0_5, %c0_6] : memref<16x32xf32, #tpu.memory_space<vmem>>, vector<16x32xf32>
    %c0_7 = arith.constant 0 : index
    %c0_8 = arith.constant 0 : index
    %4 = vector.load %arg2[%c0_7, %c0_8] : memref<16x32xf32, #tpu.memory_space<vmem>>, vector<16x32xf32>
    %5 = tpu.concatenate %2, %3, %4 in 0 : vector<16x32xf32>, vector<16x32xf32>, vector<16x32xf32> -> vector<48x32xf32>
    %6 = vector.extract_strided_slice %0 {offsets = [0, 0], sizes = [32, 96], strides = [1, 1]} : vector<32x128xf32> to vector<32x96xf32>
    %cst = arith.constant dense<0.000000e+00> : vector<48x96xf32>
    %7 = tpu.matmul %5, %6, %cst {dimension_numbers = #tpu.dot_dimension_numbers<[1], [0], [0], [1], [0, 0, 1, 1], [], []>} : vector<48x32xf32>, vector<32x96xf32>, vector<48x96xf32> -> vector<48x96xf32>
    %8 = vector.extract_strided_slice %7 {offsets = [0, 0], sizes = [16, 32], strides = [1, 1]} : vector<48x96xf32> to vector<16x32xf32>
    %9 = vector.extract_strided_slice %1 {offsets = [0, 0], sizes = [1, 32], strides = [1, 1]} : vector<1x128xf32> to vector<1x32xf32>
    %10 = vector.broadcast %9 : vector<1x32xf32> to vector<16x32xf32>
    %11 = arith.addf %8, %10 : vector<16x32xf32>
    %cst_9 = arith.constant 0.353553385 : f32
    %12 = vector.broadcast %cst_9 : f32 to vector<16x32xf32>
    %13 = arith.mulf %11, %12 : vector<16x32xf32>
    %14 = vector.extract_strided_slice %7 {offsets = [16, 32], sizes = [16, 32], strides = [1, 1]} : vector<48x96xf32> to vector<16x32xf32>
    %15 = vector.extract_strided_slice %1 {offsets = [0, 32], sizes = [1, 32], strides = [1, 1]} : vector<1x128xf32> to vector<1x32xf32>
    %16 = vector.broadcast %15 : vector<1x32xf32> to vector<16x32xf32>
    %17 = arith.addf %14, %16 : vector<16x32xf32>
    %18 = vector.extract_strided_slice %7 {offsets = [32, 64], sizes = [16, 32], strides = [1, 1]} : vector<48x96xf32> to vector<16x32xf32>
    %19 = vector.extract_strided_slice %1 {offsets = [0, 64], sizes = [1, 32], strides = [1, 1]} : vector<1x128xf32> to vector<1x32xf32>
    %20 = vector.broadcast %19 : vector<1x32xf32> to vector<16x32xf32>
    %21 = arith.addf %18, %20 : vector<16x32xf32>
    %22 = vector.extract_strided_slice %13 {offsets = [0, 0], sizes = [16, 8], strides = [1, 1]} : vector<16x32xf32> to vector<16x8xf32>
    %23 = vector.extract_strided_slice %13 {offsets = [0, 8], sizes = [16, 8], strides = [1, 1]} : vector<16x32xf32> to vector<16x8xf32>
    %24 = vector.extract_strided_slice %13 {offsets = [0, 16], sizes = [16, 8], strides = [1, 1]} : vector<16x32xf32> to vector<16x8xf32>
    %25 = vector.extract_strided_slice %13 {offsets = [0, 24], sizes = [16, 8], strides = [1, 1]} : vector<16x32xf32> to vector<16x8xf32>
    %26 = vector.shape_cast %22 : vector<16x8xf32> to vector<1x16x8xf32>
    %27 = vector.shape_cast %23 : vector<16x8xf32> to vector<1x16x8xf32>
    %28 = vector.shape_cast %24 : vector<16x8xf32> to vector<1x16x8xf32>
    %29 = vector.shape_cast %25 : vector<16x8xf32> to vector<1x16x8xf32>
    %30 = tpu.concatenate %26, %27, %28, %29 in 0 : vector<1x16x8xf32>, vector<1x16x8xf32>, vector<1x16x8xf32>, vector<1x16x8xf32> -> vector<4x16x8xf32>
    %31 = vector.extract_strided_slice %17 {offsets = [0, 0], sizes = [16, 8], strides = [1, 1]} : vector<16x32xf32> to vector<16x8xf32>
    %32 = vector.extract_strided_slice %17 {offsets = [0, 8], sizes = [16, 8], strides = [1, 1]} : vector<16x32xf32> to vector<16x8xf32>
    %33 = vector.extract_strided_slice %17 {offsets = [0, 16], sizes = [16, 8], strides = [1, 1]} : vector<16x32xf32> to vector<16x8xf32>
    %34 = vector.extract_strided_slice %17 {offsets = [0, 24], sizes = [16, 8], strides = [1, 1]} : vector<16x32xf32> to vector<16x8xf32>
    %35 = vector.shape_cast %31 : vector<16x8xf32> to vector<1x16x8xf32>
    %36 = vector.shape_cast %32 : vector<16x8xf32> to vector<1x16x8xf32>
    %37 = vector.shape_cast %33 : vector<16x8xf32> to vector<1x16x8xf32>
    %38 = vector.shape_cast %34 : vector<16x8xf32> to vector<1x16x8xf32>
    %39 = tpu.concatenate %35, %36, %37, %38 in 0 : vector<1x16x8xf32>, vector<1x16x8xf32>, vector<1x16x8xf32>, vector<1x16x8xf32> -> vector<4x16x8xf32>
    %40 = vector.extract_strided_slice %21 {offsets = [0, 0], sizes = [16, 8], strides = [1, 1]} : vector<16x32xf32> to vector<16x8xf32>
    %41 = vector.extract_strided_slice %21 {offsets = [0, 8], sizes = [16, 8], strides = [1, 1]} : vector<16x32xf32> to vector<16x8xf32>
    %42 = vector.extract_strided_slice %21 {offsets = [0, 16], sizes = [16, 8], strides = [1, 1]} : vector<16x32xf32> to vector<16x8xf32>
    %43 = vector.extract_strided_slice %21 {offsets = [0, 24], sizes = [16, 8], strides = [1, 1]} : vector<16x32xf32> to vector<16x8xf32>
    %44 = vector.shape_cast %40 : vector<16x8xf32> to vector<1x16x8xf32>
    %45 = vector.shape_cast %41 : vector<16x8xf32> to vector<1x16x8xf32>
    %46 = vector.shape_cast %42 : vector<16x8xf32> to vector<1x16x8xf32>
    %47 = vector.shape_cast %43 : vector<16x8xf32> to vector<1x16x8xf32>
    %48 = tpu.concatenate %44, %45, %46, %47 in 0 : vector<1x16x8xf32>, vector<1x16x8xf32>, vector<1x16x8xf32>, vector<1x16x8xf32> -> vector<4x16x8xf32>
    "tpu.trace_start"() <{level = 10 : i32, message = "hqd,hkd->hqk"}> : () -> ()
    %cst_10 = arith.constant dense<0.000000e+00> : vector<4x16x16xf32>
    %49 = tpu.matmul %30, %39, %cst_10 {dimension_numbers = #tpu.dot_dimension_numbers<[2], [2], [1], [1], [0, 0, 0, 1, 1, 1], [0], [0]>} : vector<4x16x8xf32>, vector<4x16x8xf32>, vector<4x16x16xf32> -> vector<4x16x16xf32>
    "tpu.trace_stop"() : () -> ()
    %50 = tpu.iota {dimensions = array<i32: 0>} : vector<16x16xi32>
    %51 = tpu.iota {dimensions = array<i32: 1>} : vector<16x16xi32>
    %c2_i32 = arith.constant 2 : i32
    %c0_i32 = arith.constant 0 : i32
    %52 = arith.cmpi eq, %c2_i32, %c0_i32 : i32
    %c1_i32 = arith.constant 1 : i32
    %53 = arith.select %52, %c1_i32, %c2_i32 : i32
    %54 = vector.broadcast %53 : i32 to vector<16x16xi32>
    %55 = arith.remsi %50, %54 : vector<16x16xi32>
    %c0_i32_11 = arith.constant 0 : i32
    %56 = vector.broadcast %c0_i32_11 : i32 to vector<16x16xi32>
    %57 = arith.cmpi ne, %55, %56 : vector<16x16xi32>
    %c0_i32_12 = arith.constant 0 : i32
    %58 = vector.broadcast %c0_i32_12 : i32 to vector<16x16xi32>
    %59 = arith.cmpi slt, %55, %58 : vector<16x16xi32>
    %c0_i32_13 = arith.constant 0 : i32
    %60 = arith.cmpi slt, %53, %c0_i32_13 : i32
    %61 = vector.broadcast %60 : i1 to vector<16x16xi1>
    %62 = vector.broadcast %61 : vector<16x16xi1> to vector<16x16xi1>
    %63 = arith.xori %59, %62 : vector<16x16xi1>
    %64 = arith.andi %63, %57 : vector<16x16xi1>
    %65 = vector.broadcast %53 : i32 to vector<16x16xi32>
    %66 = arith.addi %55, %65 : vector<16x16xi32>
    %67 = arith.select %64, %66, %55 : vector<16x16xi1>, vector<16x16xi32>
    %c2_i32_14 = arith.constant 2 : i32
    %c0_i32_15 = arith.constant 0 : i32
    %68 = arith.cmpi eq, %c2_i32_14, %c0_i32_15 : i32
    %c1_i32_16 = arith.constant 1 : i32
    %69 = arith.select %68, %c1_i32_16, %c2_i32_14 : i32
    %70 = vector.broadcast %69 : i32 to vector<16x16xi32>
    %71 = arith.remsi %51, %70 : vector<16x16xi32>
    %c0_i32_17 = arith.constant 0 : i32
    %72 = vector.broadcast %c0_i32_17 : i32 to vector<16x16xi32>
    %73 = arith.cmpi ne, %71, %72 : vector<16x16xi32>
    %c0_i32_18 = arith.constant 0 : i32
    %74 = vector.broadcast %c0_i32_18 : i32 to vector<16x16xi32>
    %75 = arith.cmpi slt, %71, %74 : vector<16x16xi32>
    %c0_i32_19 = arith.constant 0 : i32
    %76 = arith.cmpi slt, %69, %c0_i32_19 : i32
    %77 = vector.broadcast %76 : i1 to vector<16x16xi1>
    %78 = vector.broadcast %77 : vector<16x16xi1> to vector<16x16xi1>
    %79 = arith.xori %75, %78 : vector<16x16xi1>
    %80 = arith.andi %79, %73 : vector<16x16xi1>
    %81 = vector.broadcast %69 : i32 to vector<16x16xi32>
    %82 = arith.addi %71, %81 : vector<16x16xi32>
    %83 = arith.select %80, %82, %71 : vector<16x16xi1>, vector<16x16xi32>
    %84 = arith.cmpi eq, %67, %83 : vector<16x16xi32>
    %cst_20 = arith.constant -1.000000e+30 : f32
    %85 = vector.shape_cast %84 : vector<16x16xi1> to vector<1x16x16xi1>
    %86 = vector.broadcast %85 : vector<1x16x16xi1> to vector<4x16x16xi1>
    %87 = vector.broadcast %cst_20 : f32 to vector<4x16x16xf32>
    %88 = arith.select %86, %49, %87 : vector<4x16x16xi1>, vector<4x16x16xf32>
    %cst_21 = arith.constant dense<0xFF800000> : vector<4x16xf32>
    %89 = vector.multi_reduction <maximumf>, %88, %cst_21 [2] : vector<4x16x16xf32> to vector<4x16xf32>
    %90 = vector.shape_cast %89 : vector<4x16xf32> to vector<4x16x1xf32>
    %91 = vector.broadcast %90 : vector<4x16x1xf32> to vector<4x16x16xf32>
    %92 = arith.subf %88, %91 : vector<4x16x16xf32>
    %93 = math.exp %92 : vector<4x16x16xf32>
    %cst_22 = arith.constant dense<0.000000e+00> : vector<4x16xf32>
    %94 = vector.multi_reduction <add>, %93, %cst_22 [2] : vector<4x16x16xf32> to vector<4x16xf32>
    %95 = vector.shape_cast %94 : vector<4x16xf32> to vector<4x16x1xf32>
    %96 = tpu.reciprocal %95 : vector<4x16x1xf32> -> vector<4x16x1xf32>
    %97 = vector.broadcast %96 : vector<4x16x1xf32> to vector<4x16x16xf32>
    %98 = arith.mulf %93, %97 : vector<4x16x16xf32>
    "tpu.trace_start"() <{level = 10 : i32, message = "hqk,hkd->hqd"}> : () -> ()
    %cst_23 = arith.constant dense<0.000000e+00> : vector<4x16x8xf32>
    %99 = tpu.matmul %98, %48, %cst_23 {dimension_numbers = #tpu.dot_dimension_numbers<[2], [1], [1], [2], [0, 0, 0, 1, 1, 2], [0], [0]>} : vector<4x16x16xf32>, vector<4x16x8xf32>, vector<4x16x8xf32> -> vector<4x16x8xf32>
    "tpu.trace_stop"() : () -> ()
    %100 = vector.extract_strided_slice %99 {offsets = [0, 0, 0], sizes = [1, 16, 8], strides = [1, 1, 1]} : vector<4x16x8xf32> to vector<1x16x8xf32>
    %101 = vector.shape_cast %100 : vector<1x16x8xf32> to vector<16x8xf32>
    %102 = vector.extract_strided_slice %99 {offsets = [1, 0, 0], sizes = [1, 16, 8], strides = [1, 1, 1]} : vector<4x16x8xf32> to vector<1x16x8xf32>
    %103 = vector.shape_cast %102 : vector<1x16x8xf32> to vector<16x8xf32>
    %104 = vector.extract_strided_slice %99 {offsets = [2, 0, 0], sizes = [1, 16, 8], strides = [1, 1, 1]} : vector<4x16x8xf32> to vector<1x16x8xf32>
    %105 = vector.shape_cast %104 : vector<1x16x8xf32> to vector<16x8xf32>
    %106 = vector.extract_strided_slice %99 {offsets = [3, 0, 0], sizes = [1, 16, 8], strides = [1, 1, 1]} : vector<4x16x8xf32> to vector<1x16x8xf32>
    %107 = vector.shape_cast %106 : vector<1x16x8xf32> to vector<16x8xf32>
    %108 = tpu.concatenate %101, %103, %105, %107 in 1 : vector<16x8xf32>, vector<16x8xf32>, vector<16x8xf32>, vector<16x8xf32> -> vector<16x32xf32>
    %109 = vector.extract_strided_slice %0 {offsets = [0, 96], sizes = [32, 32], strides = [1, 1]} : vector<32x128xf32> to vector<32x32xf32>
    %cst_24 = arith.constant dense<0.000000e+00> : vector<16x32xf32>
    %110 = tpu.matmul %108, %109, %cst_24 {dimension_numbers = #tpu.dot_dimension_numbers<[1], [0], [0], [1], [0, 0, 1, 1], [], []>} : vector<16x32xf32>, vector<32x32xf32>, vector<16x32xf32> -> vector<16x32xf32>
    %111 = vector.extract_strided_slice %1 {offsets = [0, 96], sizes = [1, 32], strides = [1, 1]} : vector<1x128xf32> to vector<1x32xf32>
    %112 = vector.broadcast %111 : vector<1x32xf32> to vector<16x32xf32>
    %113 = arith.addf %110, %112 : vector<16x32xf32>
    %c0_25 = arith.constant 0 : index
    %c0_26 = arith.constant 0 : index
    %114 = vector.load %arg5[%c0_25, %c0_26] : memref<16x32xf32, #tpu.memory_space<vmem>>, vector<16x32xf32>
    tpu.vector_store %arg5[%c0_25, %c0_26], %113 {strides = array<i32>} : memref<16x32xf32, #tpu.memory_space<vmem>>, vector<16x32xf32>,
    return
  }
}

</mosaic_0001>

<bundles_post_ra>
// kernel: multihead_attention_pallas.1
= control target key start
LH: loop header
LB: loop body
LE: loop exit
PB: predicated region body
PF: predicated region fallthrough
CT: control target
= control target key end

     0   :  { %10 = vsyncpa [#allocation3], 0  ;;  %s1957_s0 = inlined_call_operand.hbm [shape: f32[16,32], index: 0, kind: input, shape index: {}]   ;;  %s1958_s1 = inlined_call_operand.hbm [shape: f32[16,32], index: 1, kind: input, shape index: {}]   ;;  %s1959_s2 = inlined_call_operand.vmem [shape: f32[16,32], index: 2, kind: input, shape index: {}]   ;;  %s1960_s3 = inlined_call_operand.hbm [shape: f32[32,128], index: 3, kind: input, shape index: {}]   ;;  %s1961_s4 = inlined_call_operand.vmem [shape: f32[1,128], index: 4, kind: input, shape index: {}]   ;;  %s1962_s5 = inlined_call_operand.hbm [shape: f32[16,32], index: 5, kind: output, shape index: {}]  }
   0x1   :  { %11 = vsyncpa [#allocation6], 0 }
   0x2   :  { %12 = vsyncpa [#allocation4], 0  ;;  %s1676_s18 = smov [#allocation5]   ;;  %s1677_s20 = smov [#allocation2]  }
   0x3   :  { %s30_s19 = sshll.u32 %s1676_s18, 4  ;;  %s18_s21 = sshll.u32 %s1677_s20, 4  ;;  %s31_s19 = int_to_ptr.vmem [resolvable:$true] %s30_s19  ;;  %s1720_s21 = int_to_ptr.vmem [resolvable:$true] %s18_s21 }
   0x4   :  { %s1582_s24 = scalar_lea.hbm %s1958_s1, 256 }
   0x5   :  { %p1583_p0 = scmp.ne.s32.totalorder %s1958_s1, %s1582_s24  ;;  %p1586_p1 = scmp.lt.u32.totalorder %s1582_s24, %s1958_s1 }
   0x7   :  { %p1588_p2 = pnand %p1586_p1, %p1583_p0 }
   0x9   :  { %1591 = shalt.err (!%p1588_p2)
}
   0xa   :  { %s1592_s29 = scalar_lea.vmem %s31_s19, 256  ;;  %p1597_p4 = scmp.lt.s32.totalorder %s31_s19, %s31_s19 }
   0xb   :  { %p1593_p3 = scmp.ne.s32.totalorder %s31_s19, %s1592_s29  ;;  %p1598_p5 = scmp.lt.s32.totalorder %s1592_s29, %s1592_s29 }
   0xd   :  { %p1599_p6 = por %p1598_p5, %p1597_p4 }
   0xf   :  { %p1600_p7 = pnand %p1599_p6, %p1593_p3 }
  0x11   :  { %1603 = shalt.err (!%p1600_p7)
}
  0x12   :  { %s1678_s30 = smov 128   ;;  %s1679_s6 = smov 8  }
  0x13   :  { %36 = dma.hbm_to_vmem [thread:$0]  %s1958_s1, 256, %s31_s19, [#allocation6], %s1678_s30, %s1678_s30, %s1679_s6  }
  0x14   :  { %s1604_s11 = scalar_lea.hbm %s1957_s0, 256 }
  0x15   :  { %p1605_p8 = scmp.ne.s32.totalorder %s1957_s0, %s1604_s11  ;;  %p1608_p9 = scmp.lt.u32.totalorder %s1604_s11, %s1957_s0 }
  0x17   :  { %p1610_p10 = pnand %p1608_p9, %p1605_p8 }
  0x19   :  { %1613 = shalt.err (!%p1610_p10)
}
  0x1a   :  { %s1614_s16 = scalar_lea.vmem %s1720_s21, 256  ;;  %p1619_p12 = scmp.lt.s32.totalorder %s1720_s21, %s1720_s21 }
  0x1b   :  { %p1615_p11 = scmp.ne.s32.totalorder %s1720_s21, %s1614_s16  ;;  %p1620_p13 = scmp.lt.s32.totalorder %s1614_s16, %s1614_s16 }
  0x1d   :  { %p1621_p0 = por %p1620_p13, %p1619_p12 }
  0x1f   :  { %p1622_p1 = pnand %p1621_p0, %p1615_p11 }
  0x21   :  { %1625 = shalt.err (!%p1622_p1)
}
  0x22   :  { %24 = dma.hbm_to_vmem [thread:$0]  %s1957_s0, 256, %s1720_s21, [#allocation3], %s1678_s30, %s1678_s30, %s1679_s6  }
  0x23   :  { %s1680_s18 = smov [#allocation7]   ;;  %s1626_s23 = scalar_lea.hbm %s1960_s3, 512 }
  0x24   :  { %s44_s19 = sshll.u32 %s1680_s18, 4  ;;  %p1627_p2 = scmp.ne.s32.totalorder %s1960_s3, %s1626_s23  ;;  %s45_s19 = int_to_ptr.vmem [resolvable:$true] %s44_s19 }
  0x25   :  { %p1630_p3 = scmp.lt.u32.totalorder %s1626_s23, %s1960_s3 }
  0x27   :  { %p1632_p4 = pnand %p1630_p3, %p1627_p2 }
  0x29   :  { %1635 = shalt.err (!%p1632_p4)
}
  0x2a   :  { %s1636_s28 = scalar_lea.vmem %s45_s19, 512  ;;  %p1641_p6 = scmp.lt.s32.totalorder %s45_s19, %s45_s19 }
  0x2b   :  { %p1637_p5 = scmp.ne.s32.totalorder %s45_s19, %s1636_s28  ;;  %p1642_p7 = scmp.lt.s32.totalorder %s1636_s28, %s1636_s28 }
  0x2d   :  { %p1643_p8 = por %p1642_p7, %p1641_p6 }
  0x2f   :  { %p1644_p9 = pnand %p1643_p8, %p1637_p5 }
  0x31   :  { %1647 = shalt.err (!%p1644_p9)
}
  0x32   :  { %50 = dma.hbm_to_vmem [thread:$0]  %s1960_s3, 512, %s45_s19, [#allocation6], %s1678_s30, %s1678_s30, %s1679_s6  }
  0x33   :  { %1670 = dma.done.wait [#allocation3], 256  }
  0x34   :  { %1671 = vsyncadd [#allocation3], 4294967040 }
  0x35   :  { %1672 = dma.done.wait [#allocation6], 768  }
  0x36   :  { %1673 = vsyncadd [#allocation6], 4294966528  ;;  %vm73_vm0 = vcmask 261120   ;;  %v1772_v0 = vld [vmem:[#allocation7] sm:$0xff]  ;;  %v1774_v1 = vld [vmem:[#allocation7 + $0x8] sm:$0xff]  ;;  %vm247_vm1 = vcmask 64512   ;;  %v592_v51 = vlaneseq }
  0x37   :  { %v1776_v2 = vld [vmem:[#allocation7 + $0x10] sm:$0xff]  ;;  %v1540_v3 = vpack.i.bf16 %v1774_v1, %v1772_v0  ;;  %v1400_v4 = vpack.c.bf16 %v1774_v1, %v1772_v0  ;;  %v1782_v5 = vld [vmem:[#allocation7 + $0x18] sm:$0xff]  ;;  %v67_v6 = vld [vmem:[#allocation2] sm:$0xff]  ;;  %s1681_s7 = smov 104   ;;  %s1683_s8 = smov 96   ;;  %vm647_vm5 = vcmask 130048  }
  0x38   :  { %v1404_v7 = vpack.c.bf16 %v1782_v5, %v1776_v2  ;;  %1324 = vmatprep.mubr.msk.f32.mxu0 %vm73_vm0, %v67_v6  ;;  %v68_v8 = vld [vmem:[#allocation2 + $0x8] sm:$0xff]  ;;  %v69_v9 = vld [vmem:[#allocation5] sm:$0xff]  ;;  %v70_v10 = vld [vmem:[#allocation5 + $0x8] sm:$0xff]  ;;  %s1684_s9 = smov 112   ;;  %v593_v52 = vshrl.u32 %v592_v51, 7  ;;  %v596_v58 = vand.u32 127, %v592_v51 }
  0x39   :  { %1401 = vmatprep.subr.bf16.mxu0 %v1400_v4  ;;  %v1793_v11 = vld [vmem:[%s1961_s4] ss:$0 sm:$0xff]  ;;  %s1682_s4 = smov 120   ;;  %v72_v24 = vld [vmem:[%s1959_s2 + $0x8] sm:$0xff]  ;;  %vm1812_vm2 = vmpackc.low %vm247_vm1, %vm247_vm1  ;;  %s1686_s14 = smov 32   ;;  %vm1112_vm6 = vcmask 195584  }
  0x3a   :  { %1403 = vmatpush3.bf16.msra.mxu0 %v1400_v4  ;;  %v71_v23 = vld [vmem:[%s1959_s2] sm:$0xff]  ;;  %v594_v57 = vadd.s32 8, %v593_v52  ;;  %v625_v61 = vand.u32 1, %v596_v58  ;;  %v601_v62 = vand.u32 1, %v593_v52  ;;  %s1685_s2 = smov 64   ;;  %s1687_s15 = smov 16  }
  0x3b   :  { %1405 = vmatprep.subr.bf16.mxu0 %v1404_v7  ;;  %s1688_s16 = smov 24   ;;  %s1689_s1 = smov [#allocation8]  }
  0x3c   :  { %v608_v60 = vand.u32 1, %v594_v57  ;;  %vm1852_vm4 = vcmp.eq.s32.totalorder %v601_v62, %v625_v61  ;;  %s1222_s17 = sshll.u32 %s1689_s1, 4  ;;  %s1223_s17 = int_to_ptr.vmem [resolvable:$true] %s1222_s17 }
  0x3d   :  { %s1648_s18 = scalar_lea.vmem %s1223_s17, 256  ;;  %p1653_p11 = scmp.lt.s32.totalorder %s1223_s17, %s1223_s17 }
  0x3e   :  { %1407 = vmatpush3.bf16.msra.mxu0 %v1404_v7  ;;  %vm1848_vm3 = vcmp.eq.s32.totalorder %v608_v60, %v625_v61  ;;  %p1649_p10 = scmp.ne.s32.totalorder %s1223_s17, %s1648_s18  ;;  %p1654_p12 = scmp.lt.s32.totalorder %s1648_s18, %s1648_s18 }
  0x40   :  { %p1655_p13 = por %p1654_p12, %p1653_p11 }
  0x41   :  { %1325 = vmatmul.mubr.msk.f32.vlgmr.msra.gmra.mrb[0].mxu0 %vm73_vm0, %v68_v8 }
  0x42   :  { %1327 = vmatprep.mubr.msk.f32.mxu0 %vm73_vm0, %v69_v9  ;;  %p1656_p0 = pnand %p1655_p13, %p1649_p10 }
  0x45   :  { %1328 = vmatmul.mubr.msk.f32.gmra.mrb[2].mxu0 %vm73_vm0, %v70_v10 }
  0x46   :  { %1330 = vmatprep.mubr.msk.f32.mxu0 %vm73_vm0, %v71_v23 }
  0x49   :  { %1331 = vmatmul.mubr.msk.f32.gmra.mrb[4].mxu0 %vm73_vm0, %v72_v24 }
 0x114   :  { %v1326_v12 = vpop.f32.mrb[0].mxu0 }
 0x115   :  { %v158_v13 = vpop.f32.mrb[1].mxu0  ;;  %v194_v31 = vadd.f32 %v1326_v12, %v1793_v11 }
 0x116   :  { %v193_v14 = vadd.f32 %v1793_v11, %v158_v13 }
 0x117   :  { %v196_v32 = vmul.f32 0.35355338, %v194_v31 }
 0x118   :  { %v195_v15 = vmul.f32 0.35355338, %v193_v14  ;;  %v1329_v16 = vpop.f32.mrb[2].mxu0 }
 0x119   :  { %v198_v17 = vadd.f32 %v1329_v16, %v1793_v11  ;;  %v168_v18 = vpop.f32.mrb[3].mxu0 }
 0x11a   :  { %v197_v19 = vadd.f32 %v1793_v11, %v168_v18  ;;  %1337 = vmatprep.mubr.msk.f32.mxu1 %vm247_vm1, %v195_v15 }
 0x11c   :  { %v1480_v20 = vpack.i.bf16 %v198_v17, %v197_v19  ;;  %v1332_v53 = vpop.f32.mrb[4].mxu0 }
 0x11d   :  { %v178_v54 = vpop.f32.mrb[5].mxu0  ;;  %v200_v55 = vadd.f32 %v1332_v53, %v1793_v11 }
 0x11e   :  { %1481 = vrot.lane.b32.xlu1 %v1480_v20, %s1681_s7  ;;  %1471 = vrot.lane.b32.xlu0 %v1480_v20, %s1682_s4  ;;  %v199_v56 = vadd.f32 %v1793_v11, %v178_v54 }
 0x120   :  { %v1510_v59 = vpack.i.bf16 %v200_v55, %v199_v56 }
 0x122   :  { %1486 = vrot.lane.b32.xlu1 %v1480_v20, %s1683_s8  ;;  %1476 = vrot.lane.b32.xlu0 %v1480_v20, %s1684_s9 }
 0x190   :  { %v1482_v21 = vpop.permute.xlu1 %1481  ;;  %v1472_v22 = vpop.permute.xlu0 %1471 }
 0x191   :  { %1491 = vrot.lane.b32.xlu0 %v1472_v22, %s1683_s8 }
 0x194   :  { %v1487_v25 = vpop.permute.xlu1 %1486  ;;  %v1477_v26 = vpop.permute.xlu0 %1476 }
 0x195   :  { %v1489_v27 = vunpack.i.h.bf16 %v1487_v25  ;;  %v1488_v28 = vunpack.i.l.bf16 %v1487_v25  ;;  %1496 = vrot.lane.b32.xlu1 %v1477_v26, %s1683_s8  ;;  %1501 = vrot.lane.b32.xlu0 %v1482_v21, %s1683_s8 }
 0x197   :  { %v1408_v30 = vpack.c.bf16 %v1489_v27, %v1488_v28 }
 0x199   :  { %1410 = vmatprep.subr.msk.bf16.mxu1 %vm1812_vm2, %v1408_v30  ;;  %203 = vrot.lane.b32.xlu1 %v195_v15, %s1682_s4 }
 0x19a   :  { %1413 = vmatpush3.bf16.xpose.msk.msra.mxu1 %vm1812_vm2, %v1408_v30  ;;  %205 = vrot.lane.b32.xlu0 %v196_v32, %s1682_s4 }
 0x19d   :  { %207 = vrot.lane.b32.xlu1 %v195_v15, %s1684_s9 }
 0x19e   :  { %209 = vrot.lane.b32.xlu0 %v196_v32, %s1684_s9 }
 0x1a1   :  { %1338 = vmatmul.mubr.msk.f32.vlgmr.msra.gmra.mrb[0].mxu1 %vm247_vm1, %v196_v32  ;;  %211 = vrot.lane.b32.xlu1 %v195_v15, %s1681_s7 }
 0x1a2   :  { %213 = vrot.lane.b32.xlu0 %v196_v32, %s1681_s7 }
 0x203   :  { %v1492_v33 = vpop.permute.xlu0 %1491 }
 0x204   :  { %v1494_v34 = vunpack.i.h.bf16 %v1492_v33  ;;  %v1493_v35 = vunpack.i.l.bf16 %v1492_v33 }
 0x206   :  { %v1414_v36 = vpack.c.bf16 %v1494_v34, %v1493_v35 }
 0x207   :  { %v1497_v37 = vpop.permute.xlu1 %1496  ;;  %v1502_v40 = vpop.permute.xlu0 %1501 }
 0x208   :  { %v1499_v38 = vunpack.i.h.bf16 %v1497_v37  ;;  %v1498_v39 = vunpack.i.l.bf16 %v1497_v37  ;;  %1416 = vmatprep.subr.msk.bf16.mxu1 %vm1812_vm2, %v1414_v36  ;;  %v1504_v41 = vunpack.i.h.bf16 %v1502_v40  ;;  %v1503_v42 = vunpack.i.l.bf16 %v1502_v40 }
 0x209   :  { %1419 = vmatpush3.bf16.xpose.msk.msra.mxu1 %vm1812_vm2, %v1414_v36 }
 0x20a   :  { %v1420_v43 = vpack.c.bf16 %v1499_v38, %v1498_v39  ;;  %v1426_v44 = vpack.c.bf16 %v1504_v41, %v1503_v42 }
 0x20b   :  { %v204_v45 = vpop.permute.xlu1 %203 }
 0x20c   :  { %v206_v46 = vpop.permute.xlu0 %205  ;;  %1344 = vmatprep.mubr.msk.f32.mxu1 %vm247_vm1, %v204_v45  ;;  %1422 = vmatprep.subr.msk.bf16.mxu0 %vm1812_vm2, %v1420_v43 }
 0x20d   :  { %1428 = vmatprep.subr.msk.bf16.mxu1 %vm1812_vm2, %v1426_v44  ;;  %1425 = vmatpush3.bf16.xpose.msk.msra.mxu0 %vm1812_vm2, %v1420_v43 }
 0x20f   :  { %v208_v47 = vpop.permute.xlu1 %207 }
 0x210   :  { %1345 = vmatmul.mubr.msk.f32.vlgmr.msra.gmra.mrb[2].mxu1 %vm247_vm1, %v206_v46  ;;  %1351 = vmatprep.mubr.msk.f32.mxu0 %vm247_vm1, %v208_v47  ;;  %v210_v48 = vpop.permute.xlu0 %209 }
 0x211   :  { %1431 = vmatpush3.bf16.xpose.msk.msra.mxu1 %vm1812_vm2, %v1426_v44 }
 0x213   :  { %v212_v49 = vpop.permute.xlu1 %211 }
 0x214   :  { %1352 = vmatmul.mubr.msk.f32.vlgmr.msra.gmra.mrb[6].mxu0 %vm247_vm1, %v210_v48  ;;  %1358 = vmatprep.mubr.msk.f32.mxu1 %vm247_vm1, %v212_v49  ;;  %v214_v50 = vpop.permute.xlu0 %213 }
 0x218   :  { %1359 = vmatmul.mubr.msk.f32.vlgmr.msra.gmra.mrb[4].mxu1 %vm247_vm1, %v214_v50 }
 0x274   :  { %v1339_v6 = vpop.f32.mrb[0].mxu1 }
 0x275   :  { %v640_v7 = vsel %vm1848_vm3, %v1339_v6, -1e+30  ;;  %v322_v8 = vpop.f32.mrb[1].mxu1 }
 0x276   :  { %v639_v9 = vsel %vm1852_vm4, %v322_v8, -1e+30  ;;  %v651_v10 = vsel %vm647_vm5, %v640_v7, -inf }
 0x277   :  { %652 = vmax.xlane.f32.xlu0 %v651_v10  ;;  %v648_v12 = vsel %vm647_vm5, %v639_v9, -inf }
 0x278   :  { %649 = vmax.xlane.f32.xlu1 %v648_v12 }
 0x2e3   :  { %v1346_v13 = vpop.f32.mrb[2].mxu1 }
 0x2e4   :  { %v642_v14 = vsel %vm1848_vm3, %v1346_v13, -1e+30  ;;  %v409_v15 = vpop.f32.mrb[3].mxu1 }
 0x2e5   :  { %v641_v16 = vsel %vm1852_vm4, %v409_v15, -1e+30  ;;  %v657_v17 = vsel %vm647_vm5, %v642_v14, -inf }
 0x2e6   :  { %658 = vmax.xlane.f32.xlu1 %v657_v17  ;;  %v654_v18 = vsel %vm647_vm5, %v641_v16, -inf }
 0x2e7   :  { %655 = vmax.xlane.f32.xlu0 %v654_v18  ;;  %v1353_v19 = vpop.f32.mrb[6].mxu0 }
 0x2e8   :  { %v644_v20 = vsel %vm1848_vm3, %v1353_v19, -1e+30  ;;  %v496_v21 = vpop.f32.mrb[7].mxu0 }
 0x2e9   :  { %v643_v22 = vsel %vm1852_vm4, %v496_v21, -1e+30  ;;  %v663_v23 = vsel %vm647_vm5, %v644_v20, -inf }
 0x2ea   :  { %664 = vmax.xlane.f32.xlu1 %v663_v23  ;;  %v660_v24 = vsel %vm647_vm5, %v643_v22, -inf }
 0x2eb   :  { %v1360_v25 = vpop.f32.mrb[4].mxu1  ;;  %661 = vmax.xlane.f32.xlu0 %v660_v24 }
 0x2ec   :  { %v646_v26 = vsel %vm1848_vm3, %v1360_v25, -1e+30  ;;  %v583_v27 = vpop.f32.mrb[5].mxu1 }
 0x2ed   :  { %v1878_v28 = vsel %vm1852_vm4, %v583_v27, -1e+30  ;;  %v669_v29 = vsel %vm647_vm5, %v646_v26, -inf }
 0x2ee   :  { %670 = vmax.xlane.f32.xlu1 %v669_v29  ;;  %v666_v30 = vsel %vm647_vm5, %v1878_v28, -inf }
 0x2ef   :  { %667 = vmax.xlane.f32.xlu0 %v666_v30 }
 0x2ff   :  { %1511 = vrot.lane.b32.xlu1 %v1510_v59, %s1684_s9 }
 0x303   :  { %1516 = vrot.lane.b32.xlu1 %v1510_v59, %s1681_s7 }
 0x304   :  { %v653_v33 = vpop.xlane.xlu0 %652 }
 0x305   :  { %1506 = vrot.lane.b32.xlu0 %v1510_v59, %s1682_s4  ;;  %v650_v31 = vpop.xlane.xlu1 %649  ;;  %v673_v35 = vsub.f32 %v640_v7, %v653_v33 }
 0x306   :  { %v672_v32 = vsub.f32 %v639_v9, %v650_v31 }
 0x307   :  { %1521 = vrot.lane.b32.xlu1 %v1510_v59, %s1685_s2  ;;  %v682_v36 = vmul.f32 1.442695, %v673_v35 }
 0x308   :  { %v680_v34 = vmul.f32 1.442695, %v672_v32 }
 0x30a   :  { %1550 = vpow2.f32 %v680_v34 }
 0x30b   :  { %1552 = vpow2.f32 %v682_v36 }
 0x314   :  { %v1887_v37 = vpop.eup %1550 }
 0x315   :  { %v696_v38 = vsel %vm647_vm5, %v1887_v37, 0.0  ;;  %v1891_v39 = vpop.eup %1552 }
 0x316   :  { %v699_v40 = vsel %vm647_vm5, %v1891_v39, 0.0 }
 0x324   :  { %697 = vadd.xlane.f32.xlu0 %v696_v38 }
 0x32b   :  { %700 = vadd.xlane.f32.xlu1 %v699_v40 }
 0x373   :  { %v659_v41 = vpop.xlane.xlu1 %658 }
 0x374   :  { %v675_v42 = vsub.f32 %v642_v14, %v659_v41  ;;  %v656_v43 = vpop.xlane.xlu0 %655 }
 0x375   :  { %v674_v45 = vsub.f32 %v641_v16, %v656_v43 }
 0x376   :  { %v686_v44 = vmul.f32 1.442695, %v675_v42 }
 0x377   :  { %v665_v46 = vpop.xlane.xlu1 %664  ;;  %v684_v50 = vmul.f32 1.442695, %v674_v45 }
 0x378   :  { %1554 = vpow2.f32 %v686_v44  ;;  %v677_v47 = vsub.f32 %v644_v20, %v665_v46  ;;  %v662_v48 = vpop.xlane.xlu0 %661 }
 0x379   :  { %v676_v49 = vsub.f32 %v643_v22, %v662_v48 }
 0x37a   :  { %v690_v51 = vmul.f32 1.442695, %v677_v47 }
 0x37b   :  { %v688_v52 = vmul.f32 1.442695, %v676_v49  ;;  %v671_v53 = vpop.xlane.xlu1 %670 }
 0x37c   :  { %1556 = vpow2.f32 %v690_v51  ;;  %v679_v54 = vsub.f32 %v646_v26, %v671_v53  ;;  %v668_v14 = vpop.xlane.xlu0 %667 }
 0x37d   :  { %1558 = vpow2.f32 %v688_v52  ;;  %v678_v16 = vsub.f32 %v1878_v28, %v668_v14 }
 0x37e   :  { %1560 = vpow2.f32 %v684_v50  ;;  %v694_v55 = vmul.f32 1.442695, %v679_v54 }
 0x37f   :  { %v1512_v56 = vpop.permute.xlu1 %1511  ;;  %v692_v17 = vmul.f32 1.442695, %v678_v16 }
 0x380   :  { %1562 = vpow2.f32 %v694_v55  ;;  %v1507_v15 = vpop.permute.xlu0 %1506 }
 0x381   :  { %1564 = vpow2.f32 %v692_v17 }
 0x382   :  { %v1895_v57 = vpop.eup %1554 }
 0x383   :  { %v1517_v58 = vpop.permute.xlu1 %1516  ;;  %v705_v59 = vsel %vm647_vm5, %v1895_v57, 0.0 }
 0x384   :  { %706 = vadd.xlane.f32.xlu0 %v705_v59 }
 0x386   :  { %v1557_v60 = vpop.eup %1556 }
 0x387   :  { %v1559_v61 = vpop.eup %1558  ;;  %v1522_v62 = vpop.permute.xlu1 %1521  ;;  %v711_v63 = vsel %vm647_vm5, %v1557_v60, 0.0 }
 0x388   :  { %v1561_v4 = vpop.eup %1560  ;;  %v1524_v6 = vunpack.i.h.bf16 %v1522_v62  ;;  %v1523_v7 = vunpack.i.l.bf16 %v1522_v62  ;;  %712 = vadd.xlane.f32.xlu0 %v711_v63  ;;  %v708_v8 = vsel %vm647_vm5, %v1559_v61, 0.0 }
 0x389   :  { %709 = vadd.xlane.f32.xlu1 %v708_v8  ;;  %v702_v10 = vsel %vm647_vm5, %v1561_v4, 0.0 }
 0x38a   :  { %v1432_v9 = vpack.c.bf16 %v1524_v6, %v1523_v7  ;;  %v1902_v12 = vpop.eup %1562 }
 0x38b   :  { %v717_v13 = vsel %vm647_vm5, %v1902_v12, 0.0  ;;  %v1565_v20 = vpop.eup %1564 }
 0x38c   :  { %1433 = vmatprep.subr.bf16.mxu0 %v1432_v9  ;;  %703 = vadd.xlane.f32.xlu0 %v702_v10  ;;  %v714_v22 = vsel %vm647_vm5, %v1565_v20, 0.0 }
 0x38d   :  { %1435 = vmatpush3.bf16.msra.mxu0 %v1432_v9 }
 0x390   :  { %718 = vadd.xlane.f32.xlu0 %v717_v13 }
 0x39a   :  { %1531 = vrot.lane.b32.xlu1 %v1512_v56, %s1685_s2  ;;  %v1545_v56 = vpack.i.bf16 %v1782_v5, %v1776_v2 }
 0x3a6   :  { %1526 = vrot.lane.b32.xlu0 %v1507_v15, %s1685_s2 }
 0x3aa   :  { %1541 = vrot.lane.b32.xlu0 %v1540_v3, %s1686_s14 }
 0x3b1   :  { %v698_v18 = vpop.xlane.xlu0 %697 }
 0x3b2   :  { %1566 = vrcp.f32 %v698_v18 }
 0x3b8   :  { %v701_v19 = vpop.xlane.xlu1 %700 }
 0x3b9   :  { %1568 = vrcp.f32 %v701_v19 }
 0x3bc   :  { %v1567_v21 = vpop.eup %1566 }
 0x3bd   :  { %v728_v23 = vmul.f32 %v1567_v21, %v1887_v37 }
 0x3be   :  { %715 = vadd.xlane.f32.xlu1 %v714_v22 }
 0x3bf   :  { %1365 = vmatprep.mubr.msk.f32.mxu0 %vm647_vm5, %v728_v23 }
 0x3c3   :  { %v1569_v24 = vpop.eup %1568 }
 0x3c4   :  { %v729_v25 = vmul.f32 %v1569_v24, %v1891_v39 }
 0x3c6   :  { %1366 = vmatmul.mubr.msk.f32.vlgmr.msra.gmra.mrb[8].mxu0 %vm647_vm5, %v729_v25 }
 0x3cf   :  { %1536 = vrot.lane.b32.xlu1 %v1517_v58, %s1685_s2 }
 0x3d3   :  { %1546 = vrot.lane.b32.xlu1 %v1545_v56, %s1686_s14 }
 0x411   :  { %v707_v26 = vpop.xlane.xlu0 %706 }
 0x415   :  { %v713_v27 = vpop.xlane.xlu0 %712 }
 0x416   :  { %1570 = vrcp.f32 %v713_v27  ;;  %v710_v28 = vpop.xlane.xlu1 %709 }
 0x417   :  { %1572 = vrcp.f32 %v710_v28 }
 0x419   :  { %v704_v29 = vpop.xlane.xlu0 %703 }
 0x41a   :  { %1574 = vrcp.f32 %v704_v29  ;;  %v1532_v30 = vpop.permute.xlu1 %1531 }
 0x41b   :  { %1576 = vrcp.f32 %v707_v26  ;;  %v1534_v31 = vunpack.i.h.bf16 %v1532_v30  ;;  %v1533_v32 = vunpack.i.l.bf16 %v1532_v30 }
 0x41d   :  { %v1440_v33 = vpack.c.bf16 %v1534_v31, %v1533_v32  ;;  %v719_v34 = vpop.xlane.xlu0 %718 }
 0x41e   :  { %1578 = vrcp.f32 %v719_v34 }
 0x41f   :  { %1441 = vmatprep.subr.bf16.mxu1 %v1440_v33 }
 0x420   :  { %v1571_v35 = vpop.eup %1570  ;;  %1443 = vmatpush3.bf16.msra.mxu1 %v1440_v33 }
 0x421   :  { %v1573_v36 = vpop.eup %1572  ;;  %v1527_v37 = vpop.permute.xlu0 %1526  ;;  %v733_v41 = vmul.f32 %v1571_v35, %v1557_v60 }
 0x422   :  { %v1529_v38 = vunpack.i.h.bf16 %v1527_v37  ;;  %v1528_v39 = vunpack.i.l.bf16 %v1527_v37  ;;  %v732_v40 = vmul.f32 %v1573_v36, %v1559_v61 }
 0x424   :  { %v1575_v42 = vpop.eup %1574  ;;  %v1436_v43 = vpack.c.bf16 %v1529_v38, %v1528_v39  ;;  %1379 = vmatprep.mubr.msk.f32.mxu1 %vm647_vm5, %v732_v40 }
 0x425   :  { %v1577_v44 = vpop.eup %1576  ;;  %1380 = vmatmul.mubr.msk.f32.vlgmr.msra.gmra.mrb[6].mxu1 %vm647_vm5, %v733_v41  ;;  %v730_v45 = vmul.f32 %v1575_v42, %v1561_v4  ;;  %v1542_v59 = vpop.permute.xlu0 %1541 }
 0x426   :  { %1437 = vmatprep.subr.bf16.mxu0 %v1436_v43  ;;  %v731_v46 = vmul.f32 %v1577_v44, %v1895_v57  ;;  %v1544_v61 = vunpack.i.h.bf16 %v1542_v59  ;;  %v1543_v62 = vunpack.i.l.bf16 %v1542_v59 }
 0x427   :  { %1439 = vmatpush3.bf16.msra.mxu0 %v1436_v43  ;;  %1372 = vmatprep.mubr.msk.f32.mxu0 %vm647_vm5, %v730_v45 }
 0x428   :  { %v1579_v52 = vpop.eup %1578  ;;  %v1448_v6 = vpack.c.bf16 %v1544_v61, %v1543_v62 }
 0x429   :  { %v735_v55 = vmul.f32 %v1579_v52, %v1902_v12 }
 0x42a   :  { %1373 = vmatmul.mubr.msk.f32.vlgmr.msra.gmra.mrb[10].mxu0 %vm647_vm5, %v731_v46  ;;  %1449 = vmatprep.subr.bf16.mxu1 %v1448_v6 }
 0x42b   :  { %1451 = vmatpush3.bf16.msra.mxu1 %v1448_v6 }
 0x44b   :  { %v716_v47 = vpop.xlane.xlu1 %715 }
 0x44c   :  { %1580 = vrcp.f32 %v716_v47 }
 0x44f   :  { %v1537_v48 = vpop.permute.xlu1 %1536 }
 0x450   :  { %v1539_v49 = vunpack.i.h.bf16 %v1537_v48  ;;  %v1538_v50 = vunpack.i.l.bf16 %v1537_v48 }
 0x452   :  { %v1444_v51 = vpack.c.bf16 %v1539_v49, %v1538_v50 }
 0x453   :  { %v1547_v60 = vpop.permute.xlu1 %1546 }
 0x454   :  { %1445 = vmatprep.subr.bf16.mxu0 %v1444_v51  ;;  %v1549_v63 = vunpack.i.h.bf16 %v1547_v60  ;;  %v1548_v4 = vunpack.i.l.bf16 %v1547_v60 }
 0x455   :  { %1447 = vmatpush3.bf16.msra.mxu0 %v1444_v51 }
 0x456   :  { %v1581_v53 = vpop.eup %1580  ;;  %v1452_v7 = vpack.c.bf16 %v1549_v63, %v1548_v4 }
 0x457   :  { %v734_v54 = vmul.f32 %v1581_v53, %v1565_v20 }
 0x458   :  { %1453 = vmatprep.subr.bf16.mxu1 %v1452_v7 }
 0x459   :  { %1386 = vmatprep.mubr.msk.f32.mxu0 %vm647_vm5, %v734_v54  ;;  %1455 = vmatpush3.bf16.msra.mxu1 %v1452_v7 }
 0x45a   :  { %1387 = vmatmul.mubr.msk.f32.vlgmr.msra.gmra.mrb[12].mxu0 %vm647_vm5, %v735_v55 }
 0x499   :  { %v1367_v57 = vpop.f32.mrb[8].mxu0 }
 0x49a   :  { %v814_v58 = vpop.f32.mrb[9].mxu0 }
 0x4f8   :  { %v1381_v2 = vpop.f32.mrb[6].mxu1 }
 0x4f9   :  { %v988_v5 = vpop.f32.mrb[7].mxu1 }
 0x4fd   :  { %v1374_v0 = vpop.f32.mrb[10].mxu0 }
 0x4fe   :  { %1088 = vrot.lane.b32.xlu1 %v1374_v0, %s1679_s6  ;;  %v901_v1 = vpop.f32.mrb[11].mxu0 }
 0x4ff   :  { %1086 = vrot.lane.b32.xlu0 %v901_v1, %s1679_s6 }
 0x502   :  { %1096 = vrot.lane.b32.xlu1 %v1381_v2, %s1687_s15 }
 0x503   :  { %1094 = vrot.lane.b32.xlu0 %v988_v5, %s1687_s15 }
 0x52d   :  { %v1388_v3 = vpop.f32.mrb[12].mxu0 }
 0x52e   :  { %1104 = vrot.lane.b32.xlu1 %v1388_v3, %s1688_s16  ;;  %v1075_v8 = vpop.f32.mrb[13].mxu0 }
 0x52f   :  { %1102 = vrot.lane.b32.xlu0 %v1075_v8, %s1688_s16 }
 0x533   :  { %1131 = vrot.lane.b32.xlu0 %v1793_v11, %s1686_s14 }
 0x570   :  { %v1089_v9 = vpop.permute.xlu1 %1088 }
 0x571   :  { %v1087_v10 = vpop.permute.xlu0 %1086  ;;  %v1109_v16 = vsel %vm247_vm1, %v1367_v57, %v1089_v9 }
 0x572   :  { %v1108_v14 = vsel %vm247_vm1, %v814_v58, %v1087_v10 }
 0x574   :  { %v1097_v12 = vpop.permute.xlu1 %1096 }
 0x575   :  { %v1095_v13 = vpop.permute.xlu0 %1094  ;;  %v1111_v19 = vsel %vm647_vm5, %v1109_v16, %v1097_v12 }
 0x576   :  { %v1110_v17 = vsel %vm647_vm5, %v1108_v14, %v1095_v13 }
 0x5a0   :  { %v1105_v15 = vpop.permute.xlu1 %1104 }
 0x5a1   :  { %v1103_v18 = vpop.permute.xlu0 %1102  ;;  %v1114_v21 = vsel %vm1112_vm6, %v1111_v19, %v1105_v15 }
 0x5a2   :  { %v1113_v20 = vsel %vm1112_vm6, %v1110_v17, %v1103_v18 }
 0x5a3   :  { %1397 = vmatprep.mubr.msk.f32.mxu1 %vm73_vm0, %v1113_v20 }
 0x5a4   :  { %1398 = vmatmul.mubr.msk.f32.vlgmr.msra.gmra.mrb[8].mxu1 %vm73_vm0, %v1114_v21 }
 0x5a5   :  { %v1132_v11 = vpop.permute.xlu0 %1131 }
 0x677   :  { %v1399_v22 = vpop.f32.mrb[8].mxu1 }
 0x678   :  { %v1212_v23 = vadd.f32 %v1399_v22, %v1132_v11  ;;  %v1206_v24 = vpop.f32.mrb[9].mxu1 }
 0x679   :  { %v1207_v25 = vadd.f32 %v1206_v24, %v1132_v11 }
 0x67a   :  { %1216 = vst.msk [vmem:[#allocation8 + $0x8] sm:$0xff] %vm73_vm0, %v1212_v23 }
 0x67b   :  { %1215 = vst.msk [vmem:[#allocation8] sm:$0xff] %vm73_vm0, %v1207_v25 }
 0x67c   :  { %1659 = shalt.err (!%p1656_p0)
}
 0x67d   :  { %s1660_s22 = scalar_lea.hbm %s1962_s5, 256 }
 0x67e   :  { %p1661_p1 = scmp.ne.s32.totalorder %s1962_s5, %s1660_s22  ;;  %p1664_p2 = scmp.lt.u32.totalorder %s1660_s22, %s1962_s5 }
 0x680   :  { %p1666_p3 = pnand %p1664_p2, %p1661_p1 }
 0x682   :  { %1669 = shalt.err (!%p1666_p3)
}
 0x683   :  { %1228 = dma.vmem_to_hbm [thread:$0]  %s1223_s17, 256, %s1962_s5, [#allocation4], %s1678_s30, %s1678_s30, %s1679_s6  }
 0x684   :  { %1674 = dma.done.wait [#allocation4], 256  }
 0x685   :  { %1675 = vsyncadd [#allocation4], 4294967040 }
 0x686   :  { %1232 = vsyncpa [#allocation3], 1 }
 0x687   :  { %1233 = vsyncpa [#allocation6], 1 }
 0x688   :  { %1234 = vsyncpa [#allocation4], 1 }

</bundles_post_ra>
